<compile_context>
chip_gen: v5e
topology: v5e:2x2
jax: 0.10.0
libtpu: 0.0.40
codegen_flags: <defaults>
</compile_context>

<pallas_src>
import jax
import jax.numpy as jnp
from jax.experimental import pallas as pl
from jax.experimental.pallas import tpu as pltpu


def encoder_kernel(x_ref, pos_ref, lvl_ref, o_ref):
    # x_ref:   (TB, P) float32 pixel values in [0, 1]
    # pos_ref: (P, D)  bfloat16 (+1/-1) random position hypervectors
    # lvl_ref: (L, D)  bfloat16 (+1/-1) level hypervectors
    # o_ref:   (TB, D) float32 (+1/-1) quantized sample hypervectors
    TB, P = x_ref.shape
    L = lvl_ref.shape[0]

    x = x_ref[...]                                               # (TB, P)
    # torchhd.embeddings.Level value->index (low=0.0, high=1.0):
    #   idx = clamp(round(x * (L - 1)), 0, L - 1)
    idx = jnp.round(x * (L - 1)).astype(jnp.int32)
    idx = jnp.clip(idx, 0, L - 1)                                # (TB, P)

    # One-hot over levels, built directly in bf16 (0/1 exact in bf16):
    #   onehot[b, l, p] = (idx[b, p] == l)
    lvl_iota = jax.lax.broadcasted_iota(jnp.int32, (TB, L, P), 1)
    onehot = (idx[:, None, :] == lvl_iota).astype(jnp.bfloat16)  # (TB, L, P)
    # Merge leading dims only (lanes / last dim untouched -> no relayout).
    onehot2d = onehot.reshape(TB * L, P)                         # (TB*L, P)

    # S[(b,l), d] = sum_p onehot[b,l,p] * pos[p,d]   (one MXU pass, f32 acc)
    s = jnp.dot(onehot2d, pos_ref[...],
                preferred_element_type=jnp.float32)              # (TB*L, D)
    s = s.reshape(TB, L, -1)                                     # (TB, L, D)

    # multiset(bind(pos, lvl[idx]))[b,d] = sum_l lvl[l,d] * S[b,l,d]
    lvl_f32 = lvl_ref[...].astype(jnp.float32)                   # (L, D), hoisted
    acc = jnp.sum(s * lvl_f32[None, :, :], axis=1)               # (TB, D)

    # torchhd.hard_quantize: >0 -> +1, else -1
    o_ref[...] = jnp.where(acc > 0, 1.0, -1.0).astype(o_ref.dtype)


def encoder_forward(x, pos_weight, level_weight, *, tb=8):
    """x: (B, 1, H, W) float32 in [0,1]; returns (B, D) float32 of +/-1."""
    B = x.shape[0]
    P, D = pos_weight.shape
    L = level_weight.shape[0]

    x_flat = x.reshape(B, -1).astype(jnp.float32)                # nn.Flatten
    assert x_flat.shape[1] == P, "size*size must match position embedding count"

    # Pad batch to a multiple of TB so output blocks are sublane-dense (TB, D).
    Bp = ((B + tb - 1) // tb) * tb
    if Bp != B:
        x_flat = jnp.pad(x_flat, ((0, Bp - B), (0, 0)))

    # +/-1 and 0/1 are exact in bf16; MXU accumulates in f32 -> bit-exact result.
    pos_bf16 = pos_weight.astype(jnp.bfloat16)
    lvl_bf16 = level_weight.astype(jnp.bfloat16)

    cost = pl.CostEstimate(
        flops=2 * Bp * L * P * D,
        transcendentals=0,
        bytes_accessed=(x_flat.size * 4 + pos_bf16.size * 2
                        + lvl_bf16.size * 2 + Bp * D * 4),
    )

    out = pl.pallas_call(
        encoder_kernel,
        out_shape=jax.ShapeDtypeStruct((Bp, D), jnp.float32),
        grid_spec=pltpu.PrefetchScalarGridSpec(
            num_scalar_prefetch=0,
            grid=(Bp // tb,),
            in_specs=[
                pl.BlockSpec((tb, P), lambda b: (b, 0)),   # TB input rows
                pl.BlockSpec((P, D), lambda b: (0, 0)),    # position table (resident)
                pl.BlockSpec((L, D), lambda b: (0, 0)),    # level table (resident)
            ],
            out_specs=pl.BlockSpec((tb, D), lambda b: (b, 0)),  # dense (TB, D) store
        ),
        compiler_params=pltpu.CompilerParams(
            dimension_semantics=("parallel",),
        ),
        cost_estimate=cost,
    )(x_flat, pos_bf16, lvl_bf16)

    return out[:B]


def encoder_reference(x, pos_weight, level_weight):
    """Pure-JAX reference replicating the torchhd forward semantics."""
    B = x.shape[0]
    L, _ = level_weight.shape
    xf = x.reshape(B, -1)
    idx = jnp.clip(jnp.round(xf * (L - 1)).astype(jnp.int32), 0, L - 1)
    value_hv = level_weight[idx]                                 # (B, P, D) gather
    bound = pos_weight[None, :, :] * value_hv                    # torchhd.bind
    ms = bound.sum(axis=1)                                       # torchhd.multiset
    return jnp.where(ms > 0, 1.0, -1.0)                          # torchhd.hard_quantize


if __name__ == "__main__":
    # Small shapes consistent with Encoder(out_features, size, levels)
    out_features = 128   # hypervector dimension D
    size = 16            # image side -> P = size*size = 256
    levels = 8           # number of value levels
    B = 2

    P = size * size
    D = out_features

    key = jax.random.PRNGKey(0)
    k_pos, k_lvl, k_x = jax.random.split(key, 3)

    # embeddings.Random(size*size, out_features): random bipolar (+1/-1) hypervectors
    pos_weight = jnp.where(jax.random.bernoulli(k_pos, 0.5, (P, D)), 1.0, -1.0)
    # embeddings.Level(levels, out_features): +/-1 level table
    # TODO(synk): torchhd generates *correlated* level hypervectors at init; synthetic
    # random bipolar vectors are used here (init-time only; forward lookup unchanged).
    level_weight = jnp.where(jax.random.bernoulli(k_lvl, 0.5, (levels, D)), 1.0, -1.0)

    # Input images in [0, 1] (NCHW, single channel so flatten gives size*size pixels)
    x = jax.random.uniform(k_x, (B, 1, size, size), dtype=jnp.float32)

    out = encoder_forward(x, pos_weight, level_weight)
    out = jax.block_until_ready(out)

    ref = encoder_reference(x, pos_weight, level_weight)
    assert out.shape == (B, D)
    assert bool(jnp.all(out == ref)), "Pallas kernel output mismatch vs reference"

    print("KERNEL_OK")
</pallas_src>

<mosaic_0001>
module attributes {stable_mosaic.version = 11 : i64} {
  func.func @encoder_kernel(%arg0: i32, %arg1: memref<8x256xf32, #tpu.memory_space<vmem>>, %arg2: memref<256x128xbf16, #tpu.memory_space<vmem>>, %arg3: memref<8x128xbf16, #tpu.memory_space<vmem>>, %arg4: memref<8x128xf32, #tpu.memory_space<vmem>>) attributes {dimension_semantics = [#tpu.dimension_semantics<parallel>], iteration_bounds = array<i64: 1>, scalar_prefetch = 0 : i64, scratch_operands = 0 : i64, tpu.core_type = #tpu.core_type<tc>, window_params = [{transform_indices = @transform_0, window_bounds = array<i64: 8, 256>}, {pipeline_mode = #tpu.pipeline_mode<synchronous>, transform_indices = @transform_1, window_bounds = array<i64: 256, 128>}, {pipeline_mode = #tpu.pipeline_mode<synchronous>, transform_indices = @transform_2, window_bounds = array<i64: 8, 128>}, {transform_indices = @transform_3, window_bounds = array<i64: 8, 128>}]} {
    %c0 = arith.constant 0 : index
    %c0_0 = arith.constant 0 : index
    %0 = vector.load %arg1[%c0, %c0_0] : memref<8x256xf32, #tpu.memory_space<vmem>>, vector<8x256xf32>
    %cst = arith.constant 7.000000e+00 : f32
    %1 = vector.broadcast %cst : f32 to vector<8x256xf32>
    %2 = arith.mulf %0, %1 : vector<8x256xf32>
    %3 = math.roundeven %2 : vector<8x256xf32>
    %4 = arith.fptosi %3 : vector<8x256xf32> to vector<8x256xi32>
    %c0_i32 = arith.constant 0 : i32
    %c7_i32 = arith.constant 7 : i32
    %5 = vector.broadcast %c0_i32 : i32 to vector<8x256xi32>
    %6 = arith.maxsi %5, %4 : vector<8x256xi32>
    %7 = vector.broadcast %c7_i32 : i32 to vector<8x256xi32>
    %8 = arith.minsi %7, %6 : vector<8x256xi32>
    %9 = tpu.iota {dimensions = array<i32: 1>} : vector<8x8x256xi32>
    %10 = vector.shape_cast %8 : vector<8x256xi32> to vector<8x1x256xi32>
    %11 = vector.broadcast %10 : vector<8x1x256xi32> to vector<8x8x256xi32>
    %12 = arith.cmpi eq, %11, %9 : vector<8x8x256xi32>
    %13 = arith.extui %12 : vector<8x8x256xi1> to vector<8x8x256xi32>
    %14 = arith.sitofp %13 : vector<8x8x256xi32> to vector<8x8x256xf32>
    %15 = arith.truncf %14 : vector<8x8x256xf32> to vector<8x8x256xbf16>
    %16 = vector.shape_cast %15 : vector<8x8x256xbf16> to vector<64x256xbf16>
    %c0_1 = arith.constant 0 : index
    %c0_2 = arith.constant 0 : index
    %17 = vector.load %arg2[%c0_1, %c0_2] : memref<256x128xbf16, #tpu.memory_space<vmem>>, vector<256x128xbf16>
    %cst_3 = arith.constant dense<0.000000e+00> : vector<64x128xf32>
    %18 = tpu.matmul %16, %17, %cst_3 {dimension_numbers = #tpu.dot_dimension_numbers<[1], [0], [0], [1], [0, 0, 1, 1], [], []>} : vector<64x256xbf16>, vector<256x128xbf16>, vector<64x128xf32> -> vector<64x128xf32>
    %19 = vector.shape_cast %18 : vector<64x128xf32> to vector<8x8x128xf32>
    %c0_4 = arith.constant 0 : index
    %c0_5 = arith.constant 0 : index
    %20 = vector.load %arg3[%c0_4, %c0_5] : memref<8x128xbf16, #tpu.memory_space<vmem>>, vector<8x128xbf16>
    %21 = arith.extf %20 : vector<8x128xbf16> to vector<8x128xf32>
    %22 = vector.shape_cast %21 : vector<8x128xf32> to vector<1x8x128xf32>
    %23 = vector.broadcast %22 : vector<1x8x128xf32> to vector<8x8x128xf32>
    %24 = arith.mulf %19, %23 : vector<8x8x128xf32>
    %cst_6 = arith.constant dense<0.000000e+00> : vector<8x128xf32>
    %25 = vector.multi_reduction <add>, %24, %cst_6 [1] : vector<8x8x128xf32> to vector<8x128xf32>
    %cst_7 = arith.constant 0.000000e+00 : f32
    %26 = vector.broadcast %cst_7 : f32 to vector<8x128xf32>
    %27 = arith.cmpf ogt, %25, %26 : vector<8x128xf32>
    %cst_8 = arith.constant 1.000000e+00 : f32
    %cst_9 = arith.constant -1.000000e+00 : f32
    %28 = vector.broadcast %cst_8 : f32 to vector<8x128xf32>
    %29 = vector.broadcast %cst_9 : f32 to vector<8x128xf32>
    %30 = arith.select %27, %28, %29 : vector<8x128xi1>, vector<8x128xf32>
    %c0_10 = arith.constant 0 : index
    %c0_11 = arith.constant 0 : index
    %31 = vector.load %arg4[%c0_10, %c0_11] : memref<8x128xf32, #tpu.memory_space<vmem>>, vector<8x128xf32>
    tpu.vector_store %arg4[%c0_10, %c0_11], %30 {strides = array<i32>} : memref<8x128xf32, #tpu.memory_space<vmem>>, vector<8x128xf32>,
    return
  }
  func.func @transform_0(%arg0: i32) -> (i32, i32) {
    %c0_i32 = arith.constant 0 : i32
    %c0_i32_0 = arith.constant 0 : i32
    return %arg0, %c0_i32 : i32, i32
  }
  func.func @transform_1(%arg0: i32) -> (i32, i32) {
    %c0_i32 = arith.constant 0 : i32
    %c0_i32_0 = arith.constant 0 : i32
    %c0_i32_1 = arith.constant 0 : i32
    return %c0_i32, %c0_i32_0 : i32, i32
  }
  func.func @transform_2(%arg0: i32) -> (i32, i32) {
    %c0_i32 = arith.constant 0 : i32
    %c0_i32_0 = arith.constant 0 : i32
    %c0_i32_1 = arith.constant 0 : i32
    return %c0_i32, %c0_i32_0 : i32, i32
  }
  func.func @transform_3(%arg0: i32) -> (i32, i32) {
    %c0_i32 = arith.constant 0 : i32
    %c0_i32_0 = arith.constant 0 : i32
    return %arg0, %c0_i32 : i32, i32
  }
}

</mosaic_0001>

<bundles_post_ra>
// kernel: tpu_custom_call.1
= control target key start
LH: loop header
LB: loop body
LE: loop exit
PB: predicated region body
PF: predicated region fallthrough
CT: control target
= control target key end

     0   :  { %8 = vsyncpa [#allocation3], 0  ;;  %s855_s0 = inlined_call_operand.hbm [shape: f32[8,256], index: 0, kind: input, shape index: {}]   ;;  %s856_s1 = inlined_call_operand.hbm [shape: bf16[256,128], index: 1, kind: input, shape index: {}]   ;;  %s857_s2 = inlined_call_operand.hbm [shape: bf16[8,128], index: 2, kind: input, shape index: {}]   ;;  %s858_s3 = inlined_call_operand.hbm [shape: f32[8,128], index: 3, kind: output, shape index: {}]  }
   0x1   :  { %9 = vsyncpa [#allocation6], 0  ;;  %s26_s14 = sshll.u32 %s856_s1, 4  ;;  %s27_s14 = int_to_ptr.hbm [resolvable:$true] %s26_s14 }
   0x2   :  { %10 = vsyncpa [#allocation4], 0  ;;  %s734_s15 = smov [#allocation5]   ;;  %s16_s19 = sshll.u32 %s855_s0, 4  ;;  %s17_s19 = int_to_ptr.hbm [resolvable:$true] %s16_s19 }
   0x3   :  { %s28_s16 = sshll.u32 %s734_s15, 4  ;;  %s735_s20 = smov 64   ;;  %s29_s16 = int_to_ptr.vmem [resolvable:$true] %s28_s16 }
   0x4   :  { %s736_s21 = smov 4   ;;  %s737_s22 = smov [#allocation2]  }
   0x5   :  { %34 = dma.hbm_to_vmem [thread:$0]  %s27_s14, 2048, %s29_s16, [#allocation6], %s735_s20, %s735_s20, %s736_s21  }
   0x6   :  { %s18_s23 = sshll.u32 %s737_s22, 4  ;;  %s40_s26 = sshll.u32 %s857_s2, 4  ;;  %s19_s23 = int_to_ptr.vmem [resolvable:$true] %s18_s23  ;;  %s41_s26 = int_to_ptr.hbm [resolvable:$true] %s40_s26 }
   0x7   :  { %21 = dma.hbm_to_vmem [thread:$0]  %s17_s19, 256, %s19_s23, [#allocation3]  }
   0x8   :  { %s738_s1 = smov [#allocation7]  }
   0x9   :  { %s42_s27 = sshll.u32 %s738_s1, 4  ;;  %s43_s27 = int_to_ptr.vmem [resolvable:$true] %s42_s27 }
   0xa   :  { %45 = dma.hbm_to_vmem [thread:$0]  %s41_s26, 64, %s43_s27, [#allocation6]  }
   0xb   :  { %728 = dma.done.wait [#allocation3], 256  }
   0xc   :  { %729 = vsyncadd [#allocation3], 4294967040 }
   0xd   :  { %730 = dma.done.wait [#allocation6], 2112  }
   0xe   :  { %731 = vsyncadd [#allocation6], 4294965184  ;;  %v593_v0 = vld [vmem:[#allocation5 + $0x38] sm:$0xff]  ;;  %v592_v2 = vld [vmem:[#allocation5 + $0x30] sm:$0xff]  ;;  %v72_v16 = vlaneseq  ;;  %vm75_vm4 = vcmask 1040384   ;;  %vm77_vm5 = vcmask 1041409  }
   0xf   :  { %v601_v1 = vld [vmem:[#allocation5 + $0x78] sm:$0xff]  ;;  %338 = vmatpush.bf16.msra.mxu0 %v593_v0  ;;  %602 = vmatpush.bf16.msra.mxu2 %v593_v0  ;;  %v600_v3 = vld [vmem:[#allocation5 + $0x70] sm:$0xff]  ;;  %v591_v6 = vld [vmem:[#allocation5 + $0x28] sm:$0xff]  ;;  %vm86_vm6 = vcmask 1044484   ;;  %vm89_vm7 = vcmask 1045509   ;;  %vm80_vm8 = vcmask 1042434  }
  0x10   :  { %367 = vmatpush.bf16.msra.mxu1 %v601_v1  ;;  %610 = vmatpush.bf16.msra.mxu3 %v601_v1  ;;  %v58_v4 = vld [vmem:[#allocation2] sm:$0xff]  ;;  %v59_v5 = vld [vmem:[#allocation2 + $0x8] sm:$0xff]  ;;  %v599_v9 = vld [vmem:[#allocation5 + $0x68] sm:$0xff]  ;;  %v775_v22 = vshrl.u32 %v72_v16, 7  ;;  %vm83_vm9 = vcmask 1043459   ;;  %vm92_vm10 = vcmask 1046534  }
  0x11   :  { %v60_v7 = vmul.f32 7.0, %v58_v4  ;;  %v61_v8 = vmul.f32 7.0, %v59_v5  ;;  %v590_v12 = vld [vmem:[#allocation5 + $0x20] sm:$0xff]  ;;  %v589_v19 = vld [vmem:[#allocation5 + $0x18] sm:$0xff]  ;;  %v588_v31 = vld [vmem:[#allocation5 + $0x10] sm:$0xff]  ;;  %vm95_vm11 = vcmask 1046528  }
  0x12   :  { %v598_v13 = vld [vmem:[#allocation5 + $0x60] sm:$0xff]  ;;  %v597_v21 = vld [vmem:[#allocation5 + $0x58] sm:$0xff]  ;;  %v596_v36 = vld [vmem:[#allocation5 + $0x50] sm:$0xff]  ;;  %v739_v39 = vmov 0.0   ;;  %s741_s0 = smov [#allocation8]   ;;  %s495_s30 = sshll.u32 %s858_s3, 4  ;;  %s496_s30 = int_to_ptr.hbm [resolvable:$true] %s495_s30 }
  0x13   :  { %339 = vmatpush.bf16.msra.mxu0 %v592_v2  ;;  %603 = vmatpush.bf16.msra.mxu2 %v592_v2  ;;  %v620_v10 = vcvt.f32.s32 %v60_v7  ;;  %v623_v11 = vcvt.f32.s32 %v61_v8  ;;  %v587_v46 = vld [vmem:[#allocation5 + $0x8] sm:$0xff]  ;;  %v586_v60 = vld [vmem:[#allocation5] sm:$0xff]  ;;  %s493_s2 = sshll.u32 %s741_s0, 4  ;;  %s494_s2 = int_to_ptr.vmem [resolvable:$true] %s493_s2 }
  0x14   :  { %368 = vmatpush.bf16.msra.mxu1 %v600_v3  ;;  %611 = vmatpush.bf16.msra.mxu3 %v600_v3  ;;  %v595_v50 = vld [vmem:[#allocation5 + $0x48] sm:$0xff]  ;;  %v594_v1 = vld [vmem:[#allocation5 + $0x40] sm:$0xff] }
  0x15   :  { %vm64_vm0 = vcmp.gt.s32.totalorder %v620_v10, 0  ;;  %vm66_vm1 = vcmp.gt.s32.totalorder %v623_v11, 0 }
  0x16   :  { %v65_v14 = vsel %vm64_vm0, %v620_v10, 0  ;;  %v67_v15 = vsel %vm66_vm1, %v623_v11, 0 }
  0x17   :  { %340 = vmatpush.bf16.msra.mxu0 %v591_v6  ;;  %604 = vmatpush.bf16.msra.mxu2 %v591_v6  ;;  %vm68_vm2 = vcmp.lt.s32.totalorder %v65_v14, 7  ;;  %vm70_vm3 = vcmp.lt.s32.totalorder %v67_v15, 7 }
  0x18   :  { %369 = vmatpush.bf16.msra.mxu1 %v599_v9  ;;  %612 = vmatpush.bf16.msra.mxu3 %v599_v9  ;;  %v771_v17 = vsel %vm68_vm2, %v65_v14, 7  ;;  %v71_v18 = vsel %vm70_vm3, %v67_v15, 7 }
  0x19   :  { %v773_v20 = vrot.slane %v71_v18, 7 }
  0x1b   :  { %341 = vmatpush.bf16.msra.mxu0 %v590_v12  ;;  %605 = vmatpush.bf16.msra.mxu2 %v590_v12  ;;  %v76_v23 = vsel %vm75_vm4, %v771_v17, %v773_v20  ;;  %v78_v24 = vsel %vm77_vm5, %v771_v17, %v773_v20  ;;  %v87_v25 = vsel %vm86_vm6, %v771_v17, %v773_v20 }
  0x1c   :  { %370 = vmatpush.bf16.msra.mxu1 %v598_v13  ;;  %613 = vmatpush.bf16.msra.mxu3 %v598_v13  ;;  %v90_v26 = vsel %vm89_vm7, %v771_v17, %v773_v20  ;;  %v79_v27 = vrot.slane %v78_v24, 1  ;;  %v98_v28 = vperm.slane %v76_v23, 0  ;;  %v99_v29 = vperm.slane %v76_v23, 1 }
  0x1d   :  { %v88_v30 = vrot.slane %v87_v25, 4  ;;  %v91_v32 = vrot.slane %v90_v26, 5  ;;  %v81_v33 = vsel %vm80_vm8, %v771_v17, %v773_v20  ;;  %v84_v34 = vsel %vm83_vm9, %v771_v17, %v773_v20 }
  0x1e   :  { %v798_v35 = vsel %vm92_vm10, %v771_v17, %v773_v20  ;;  %v100_v37 = vperm.slane %v79_v27, 0  ;;  %v101_v38 = vperm.slane %v79_v27, 1  ;;  %vm114_vm12 = vcmp.eq.s32.totalorder %v98_v28, %v775_v22 }
  0x1f   :  { %342 = vmatpush.bf16.msra.mxu0 %v589_v19  ;;  %606 = vmatpush.bf16.msra.mxu2 %v589_v19  ;;  %vm115_vm13 = vcmp.eq.s32.totalorder %v99_v29, %v775_v22  ;;  %v506_v40 = vsel %vm114_vm12, 1.0, %v739_v39  ;;  %v106_v42 = vperm.slane %v88_v30, 0  ;;  %v107_v43 = vperm.slane %v88_v30, 1 }
  0x20   :  { %371 = vmatpush.bf16.msra.mxu1 %v597_v21  ;;  %614 = vmatpush.bf16.msra.mxu3 %v597_v21  ;;  %v507_v41 = vsel %vm115_vm13, 1.0, %v739_v39  ;;  %vm116_vm14 = vcmp.eq.s32.totalorder %v100_v37, %v775_v22  ;;  %vm117_vm15 = vcmp.eq.s32.totalorder %v101_v38, %v775_v22  ;;  %v108_v45 = vperm.slane %v91_v32, 0 }
  0x21   :  { %v162_v44 = vpack.c.bf16 %v507_v41, %v506_v40  ;;  %v508_v47 = vsel %vm116_vm14, 1.0, %v739_v39  ;;  %v509_v48 = vsel %vm117_vm15, 1.0, %v739_v39  ;;  %v109_v49 = vperm.slane %v91_v32, 1 }
  0x22   :  { %vm122_vm0 = vcmp.eq.s32.totalorder %v106_v42, %v775_v22  ;;  %v163_v51 = vpack.c.bf16 %v509_v48, %v508_v47  ;;  %vm123_vm1 = vcmp.eq.s32.totalorder %v107_v43, %v775_v22  ;;  %vm124_vm2 = vcmp.eq.s32.totalorder %v108_v45, %v775_v22  ;;  %v396_v47 = vld [vmem:[#allocation7] sm:$0xf] }
  0x23   :  { %343 = vmatpush.bf16.msra.mxu0 %v588_v31  ;;  %607 = vmatpush.bf16.msra.mxu2 %v588_v31  ;;  %v210_v52 = vunpack.c.l.b16 %v162_v44  ;;  %vm125_vm3 = vcmp.eq.s32.totalorder %v109_v49, %v775_v22  ;;  %v514_v53 = vsel %vm122_vm0, 1.0, %v739_v39  ;;  %v515_v54 = vsel %vm123_vm1, 1.0, %v739_v39 }
  0x24   :  { %372 = vmatpush.bf16.msra.mxu1 %v596_v36  ;;  %615 = vmatpush.bf16.msra.mxu3 %v596_v36  ;;  %v516_v55 = vsel %vm124_vm2, 1.0, %v739_v39  ;;  %v212_v56 = vunpack.c.l.b16 %v163_v51  ;;  %v517_v57 = vsel %vm125_vm3, 1.0, %v739_v39  ;;  %v166_v58 = vpack.c.bf16 %v515_v54, %v514_v53 }
  0x25   :  { %v211_v59 = vunpack.c.h.b16 %v162_v44  ;;  %v167_v61 = vpack.c.bf16 %v517_v57, %v516_v55  ;;  %v213_v62 = vunpack.c.h.b16 %v163_v51  ;;  %v82_v63 = vrot.slane %v81_v33, 2 }
  0x26   :  { %v85_v0 = vrot.slane %v84_v34, 3  ;;  %v226_v2 = vpack.c.b16 %v212_v56, %v210_v52  ;;  %v218_v3 = vunpack.c.l.b16 %v166_v58  ;;  %v219_v4 = vunpack.c.h.b16 %v166_v58 }
  0x27   :  { %344 = vmatpush.bf16.msra.mxu0 %v587_v46  ;;  %608 = vmatpush.bf16.msra.mxu2 %v587_v46  ;;  %v94_v5 = vrot.slane %v798_v35, 6  ;;  %v220_v6 = vunpack.c.l.b16 %v167_v61  ;;  %v227_v7 = vpack.c.b16 %v213_v62, %v211_v59  ;;  %v221_v8 = vunpack.c.h.b16 %v167_v61 }
  0x28   :  { %373 = vmatpush.bf16.msra.mxu1 %v595_v50  ;;  %616 = vmatpush.bf16.msra.mxu3 %v595_v50  ;;  %v102_v9 = vperm.slane %v82_v63, 0  ;;  %v103_v10 = vperm.slane %v82_v63, 1  ;;  %v104_v11 = vperm.slane %v85_v0, 0  ;;  %v105_v12 = vperm.slane %v85_v0, 1 }
  0x29   :  { %v96_v13 = vsel %vm95_vm11, %v773_v20, %v771_v17  ;;  %v230_v14 = vpack.c.b16 %v220_v6, %v218_v3  ;;  %v231_v15 = vpack.c.b16 %v221_v8, %v219_v4  ;;  %v110_v18 = vperm.slane %v94_v5, 0 }
  0x2a   :  { %vm118_vm4 = vcmp.eq.s32.totalorder %v102_v9, %v775_v22  ;;  %v97_v16 = vrot.slane %v96_v13, 7  ;;  %vm119_vm12 = vcmp.eq.s32.totalorder %v103_v10, %v775_v22  ;;  %vm120_vm13 = vcmp.eq.s32.totalorder %v104_v11, %v775_v22 }
  0x2b   :  { %345 = vmatpush.bf16.msra.mxu0 %v586_v60  ;;  %609 = vmatpush.bf16.msra.mxu2 %v586_v60  ;;  %vm121_vm14 = vcmp.eq.s32.totalorder %v105_v12, %v775_v22  ;;  %v510_v17 = vsel %vm118_vm4, 1.0, %v739_v39  ;;  %v511_v19 = vsel %vm119_vm12, 1.0, %v739_v39  ;;  %v111_v20 = vperm.slane %v94_v5, 1 }
  0x2c   :  { %374 = vmatpush.bf16.msra.mxu1 %v594_v1  ;;  %617 = vmatpush.bf16.msra.mxu3 %v594_v1  ;;  %v112_v21 = vperm.slane %v97_v16, 0  ;;  %v512_v23 = vsel %vm120_vm13, 1.0, %v739_v39  ;;  %v513_v24 = vsel %vm121_vm14, 1.0, %v739_v39  ;;  %v113_v25 = vperm.slane %v97_v16, 1 }
  0x2d   :  { %vm126_vm11 = vcmp.eq.s32.totalorder %v110_v18, %v775_v22  ;;  %vm127_vm15 = vcmp.eq.s32.totalorder %v111_v20, %v775_v22  ;;  %v164_v29 = vpack.c.bf16 %v511_v19, %v510_v17  ;;  %v165_v30 = vpack.c.bf16 %v513_v24, %v512_v23 }
  0x2e   :  { %346 = vmatmul.bf16.vlgmr.msra.gmra.mxu0 %v226_v2  ;;  %356 = vmatmul.bf16.vlgmr.msra.gmra.mxu2 %v230_v14  ;;  %vm128_vm0 = vcmp.eq.s32.totalorder %v112_v21, %v775_v22  ;;  %vm129_vm1 = vcmp.eq.s32.totalorder %v113_v25, %v775_v22  ;;  %v518_v26 = vsel %vm126_vm11, 1.0, %v739_v39  ;;  %v519_v27 = vsel %vm127_vm15, 1.0, %v739_v39 }
  0x2f   :  { %375 = vmatmul.bf16.vlgmr.msra.gmra.mxu1 %v227_v7  ;;  %385 = vmatmul.bf16.vlgmr.msra.gmra.mxu3 %v231_v15  ;;  %v520_v28 = vsel %vm128_vm0, 1.0, %v739_v39  ;;  %v521_v31 = vsel %vm129_vm1, 1.0, %v739_v39  ;;  %v168_v32 = vpack.c.bf16 %v519_v27, %v518_v26  ;;  %v214_v34 = vunpack.c.l.b16 %v164_v29 }
  0x30   :  { %v169_v33 = vpack.c.bf16 %v521_v31, %v520_v28  ;;  %v216_v35 = vunpack.c.l.b16 %v165_v30  ;;  %v215_v38 = vunpack.c.h.b16 %v164_v29  ;;  %v217_v40 = vunpack.c.h.b16 %v165_v30 }
  0x31   :  { %v222_v36 = vunpack.c.l.b16 %v168_v32  ;;  %v223_v41 = vunpack.c.h.b16 %v168_v32  ;;  %v836_v49 = vunpack.c.l.bf16 %v396_v47 }
  0x32   :  { %v224_v37 = vunpack.c.l.b16 %v169_v33  ;;  %v225_v22 = vunpack.c.h.b16 %v169_v33  ;;  %v228_v42 = vpack.c.b16 %v216_v35, %v214_v34  ;;  %v229_v44 = vpack.c.b16 %v217_v40, %v215_v38 }
  0x34   :  { %v232_v43 = vpack.c.b16 %v224_v37, %v222_v36  ;;  %v233_v45 = vpack.c.b16 %v225_v22, %v223_v41 }
  0x3e   :  { %351 = vmatmul.bf16.gmra.mxu0 %v228_v42  ;;  %361 = vmatmul.bf16.gmra.mxu2 %v232_v43 }
  0x3f   :  { %380 = vmatmul.bf16.gmra.mxu1 %v229_v44  ;;  %390 = vmatmul.bf16.gmra.mxu3 %v233_v45 }
  0xab   :  { %v347_v46 = vpop.f32.mrf.mxu0 }
  0xac   :  { %v376_v39 = vpop.f32.mrf.mxu1 }
  0xad   :  { %v377_v48 = vadd.f32 %v376_v39, %v347_v46 }
  0xaf   :  { %v398_v53 = vmul.f32 %v836_v49, %v377_v48 }
  0xb1   :  { %v357_v50 = vpop.f32.mrf.mxu2  ;;  %v406_v58 = vrot.slane %v398_v53, 4 }
  0xb2   :  { %v386_v51 = vpop.f32.mrf.mxu3 }
  0xb3   :  { %v349_v52 = vpop.f32.mrf.mxu0  ;;  %v387_v54 = vadd.f32 %v386_v51, %v357_v50  ;;  %v407_v2 = vadd.f32 %v406_v58, %v398_v53  ;;  %v740_v58 = vmov -1.0  }
  0xb4   :  { %v378_v55 = vpop.f32.mrf.mxu1 }
  0xb5   :  { %v379_v56 = vadd.f32 %v378_v55, %v349_v52  ;;  %v402_v59 = vmul.f32 %v836_v49, %v387_v54  ;;  %v408_v9 = vrot.slane %v407_v2, 2 }
  0xb7   :  { %v399_v57 = vmul.f32 %v836_v49, %v379_v56  ;;  %v430_v3 = vrot.slane %v402_v59, 4  ;;  %v409_v19 = vadd.f32 %v408_v9, %v407_v2 }
  0xb9   :  { %v412_v60 = vrot.slane %v399_v57, 4  ;;  %v359_v61 = vpop.f32.mrf.mxu2  ;;  %v431_v10 = vadd.f32 %v430_v3, %v402_v59  ;;  %v410_v31 = vrot.slane %v409_v19, 1 }
  0xba   :  { %v388_v62 = vpop.f32.mrf.mxu3 }
  0xbb   :  { %v413_v63 = vadd.f32 %v412_v60, %v399_v57  ;;  %v389_v0 = vadd.f32 %v388_v62, %v359_v61  ;;  %v352_v1 = vpop.f32.mrf.mxu0  ;;  %v432_v20 = vrot.slane %v431_v10, 2  ;;  %v411_v44 = vadd.f32 %v410_v31, %v409_v19 }
  0xbc   :  { %v381_v4 = vpop.f32.mrf.mxu1 }
  0xbd   :  { %v403_v5 = vmul.f32 %v836_v49, %v389_v0  ;;  %v382_v6 = vadd.f32 %v381_v4, %v352_v1  ;;  %v414_v7 = vrot.slane %v413_v63, 2  ;;  %v433_v32 = vadd.f32 %v432_v20, %v431_v10 }
  0xbe   :  { %vm454_vm4 = vcmp.gt.f32.partialorder %v411_v44, 0.0 }
  0xbf   :  { %v436_v8 = vrot.slane %v403_v5, 4  ;;  %v400_v11 = vmul.f32 %v836_v49, %v382_v6  ;;  %v415_v16 = vadd.f32 %v414_v7, %v413_v63  ;;  %v434_v45 = vrot.slane %v433_v32, 1 }
  0xc0   :  { %v462_v63 = vsel %vm454_vm4, 1.0, %v740_v58 }
  0xc1   :  { %v437_v12 = vadd.f32 %v436_v8, %v403_v5  ;;  %v362_v13 = vpop.f32.mrf.mxu2  ;;  %v418_v14 = vrot.slane %v400_v11, 4  ;;  %v416_v28 = vrot.slane %v415_v16, 1  ;;  %v435_v53 = vadd.f32 %v434_v45, %v433_v32 }
  0xc2   :  { %v391_v15 = vpop.f32.mrf.mxu3 }
  0xc3   :  { %v392_v18 = vadd.f32 %v391_v15, %v362_v13  ;;  %v354_v17 = vpop.f32.mrf.mxu0  ;;  %v419_v21 = vadd.f32 %v418_v14, %v400_v11  ;;  %v438_v24 = vrot.slane %v437_v12, 2  ;;  %v417_v41 = vadd.f32 %v416_v28, %v415_v16 }
  0xc4   :  { %v383_v23 = vpop.f32.mrf.mxu1  ;;  %vm458_vm12 = vcmp.gt.f32.partialorder %v435_v53, 0.0 }
  0xc5   :  { %v404_v25 = vmul.f32 %v836_v49, %v392_v18  ;;  %v384_v26 = vadd.f32 %v383_v23, %v354_v17  ;;  %v420_v27 = vrot.slane %v419_v21, 2  ;;  %v439_v34 = vadd.f32 %v438_v24, %v437_v12 }
  0xc6   :  { %vm455_vm2 = vcmp.gt.f32.partialorder %v417_v41, 0.0  ;;  %v466_v4 = vsel %vm458_vm12, 1.0, %v740_v58 }
  0xc7   :  { %v442_v29 = vrot.slane %v404_v25, 4  ;;  %v401_v30 = vmul.f32 %v836_v49, %v384_v26  ;;  %v421_v33 = vadd.f32 %v420_v27, %v419_v21  ;;  %v440_v39 = vrot.slane %v439_v34, 1 }
  0xc8   :  { %v463_v59 = vsel %vm455_vm2, 1.0, %v740_v58 }
  0xc9   :  { %v443_v35 = vadd.f32 %v442_v29, %v404_v25  ;;  %v424_v36 = vrot.slane %v401_v30, 4  ;;  %v364_v37 = vpop.f32.mrf.mxu2  ;;  %v422_v38 = vrot.slane %v421_v33, 1  ;;  %v441_v55 = vadd.f32 %v440_v39, %v439_v34 }
  0xca   :  { %v393_v40 = vpop.f32.mrf.mxu3 }
  0xcb   :  { %v444_v22 = vrot.slane %v443_v35, 2  ;;  %v425_v42 = vadd.f32 %v424_v36, %v401_v30  ;;  %v394_v43 = vadd.f32 %v393_v40, %v364_v37  ;;  %v423_v46 = vadd.f32 %v422_v38, %v421_v33 }
  0xcc   :  { %vm459_vm13 = vcmp.gt.f32.partialorder %v441_v55, 0.0 }
  0xcd   :  { %v445_v47 = vadd.f32 %v444_v22, %v443_v35  ;;  %v426_v48 = vrot.slane %v425_v42, 2  ;;  %v405_v50 = vmul.f32 %v836_v49, %v394_v43  ;;  %vm456_vm3 = vcmp.gt.f32.partialorder %v423_v46, 0.0 }
  0xce   :  { %v464_v60 = vsel %vm456_vm3, 1.0, %v740_v58  ;;  %v478_v49 = vsel %vm77_vm5, %v463_v59, %v462_v63  ;;  %v467_v7 = vsel %vm459_vm13, 1.0, %v740_v58  ;;  %vm484_vm5 = vcmask 1047559  }
  0xcf   :  { %v427_v51 = vadd.f32 %v426_v48, %v425_v42  ;;  %v448_v52 = vrot.slane %v405_v50, 4  ;;  %v446_v54 = vrot.slane %v445_v47, 1  ;;  %v479_v2 = vsel %vm80_vm8, %v464_v60, %v478_v49 }
  0xd1   :  { %v428_v56 = vrot.slane %v427_v51, 1  ;;  %v449_v57 = vadd.f32 %v448_v52, %v405_v50  ;;  %v447_v0 = vadd.f32 %v446_v54, %v445_v47 }
  0xd3   :  { %v429_v61 = vadd.f32 %v428_v56, %v427_v51  ;;  %v450_v62 = vrot.slane %v449_v57, 2  ;;  %vm460_vm11 = vcmp.gt.f32.partialorder %v447_v0, 0.0 }
  0xd4   :  { %v468_v11 = vsel %vm460_vm11, 1.0, %v740_v58 }
  0xd5   :  { %vm457_vm14 = vcmp.gt.f32.partialorder %v429_v61, 0.0  ;;  %v451_v1 = vadd.f32 %v450_v62, %v449_v57 }
  0xd6   :  { %v465_v3 = vsel %vm457_vm14, 1.0, %v740_v58 }
  0xd7   :  { %v480_v5 = vsel %vm83_vm9, %v465_v3, %v479_v2  ;;  %v452_v6 = vrot.slane %v451_v1, 1 }
  0xd8   :  { %v481_v8 = vsel %vm86_vm6, %v466_v4, %v480_v5 }
  0xd9   :  { %v453_v9 = vadd.f32 %v452_v6, %v451_v1  ;;  %v482_v10 = vsel %vm89_vm7, %v467_v7, %v481_v8 }
  0xda   :  { %v483_v13 = vsel %vm92_vm10, %v468_v11, %v482_v10 }
  0xdb   :  { %vm461_vm8 = vcmp.gt.f32.partialorder %v453_v9, 0.0 }
  0xdc   :  { %v469_v12 = vsel %vm461_vm8, 1.0, %v740_v58 }
  0xdd   :  { %v485_v14 = vsel %vm484_vm5, %v469_v12, %v483_v13 }
  0xde   :  { %487 = vst [vmem:[#allocation8] sm:$0xff] %v485_v14 }
  0xdf   :  { %498 = dma.vmem_to_hbm [thread:$0]  %s494_s2, 128, %s496_s30, [#allocation4]  }
  0xe0   :  { %732 = dma.done.wait [#allocation4], 128  }
  0xe1   :  { %733 = vsyncadd [#allocation4], 4294967168 }
  0xe2   :  { %503 = vsyncpa [#allocation3], 1 }
  0xe3   :  { %504 = vsyncpa [#allocation6], 1 }
  0xe4   :  { %505 = vsyncpa [#allocation4], 1 }

</bundles_post_ra>
